<compile_context>
chip_gen: v7x
topology: tpu7x:2x2x1
jax: 0.10.0
libtpu: 0.0.40
codegen_flags: <defaults>
</compile_context>

<pallas_src>
import functools
import math

import jax
import jax.numpy as jnp
from jax import lax
from jax.experimental import pallas as pl
from jax.experimental.pallas import tpu as pltpu

_NEG_BIG = -1e30  # finite "-inf" fill: exp() underflows cleanly to 0, no inf-inf NaN corners


def _attention_kernel(xf_ref, w1b_ref, b1t_ref, g2_ref, o_ref):
    """One batch tile. xf_ref block is (T, bt*D); column c = (local batch)*D + d."""
    xf = xf_ref[...]                                                     # (T, btd) f32
    T = xf.shape[0]

    # ---- scoring: h = tanh(x @ W1^T + b1);  score = h @ w2 (folded layout; b2 dropped,
    #      softmax is shift-invariant) -------------------------------------------------
    h = jnp.tanh(
        jnp.dot(xf, w1b_ref[...], preferred_element_type=jnp.float32) + b1t_ref[...]
    )                                                                    # (T, btd)
    # g2 = blkdiag_b(w2 . 1^T): reduces each batch's D lanes against w2 and re-broadcasts
    # the per-(t, batch) score across the same D lanes -> scores stays (T, btd) lane-dense.
    scores = jnp.dot(h, g2_ref[...], preferred_element_type=jnp.float32)  # (T, btd)

    # ---- causal prefix softmax-weighted sum: flash-style associative scan over T -----
    # Per-row state (m, num, den): m is the running prefix max; num/den are rescaled to it.
    m = scores
    num = xf                                   # exp(scores - m) == 1 at init
    den = jnp.ones_like(scores)
    row = lax.broadcasted_iota(jnp.int32, scores.shape, 0)

    shift = 1
    while shift < T:                           # static python loop: ceil(log2(T)) steps
        valid = row >= shift
        m_s = jnp.where(valid, pltpu.roll(m, shift, axis=0), _NEG_BIG)
        n_s = jnp.where(valid, pltpu.roll(num, shift, axis=0), 0.0)
        d_s = jnp.where(valid, pltpu.roll(den, shift, axis=0), 0.0)
        # Exactly one of the two rescale factors is exp(0)=1 -> compute a single exp.
        diff = m - m_s
        e = jnp.exp(-jnp.abs(diff))            # EUP (one transcendental per step)
        keep = diff >= 0.0                     # m >= m_s
        a = jnp.where(keep, 1.0, e)
        b = jnp.where(keep, e, 1.0)
        num = num * a + n_s * b                # VPU
        den = den * a + d_s * b
        m = jnp.maximum(m, m_s)
        shift *= 2
    # TODO(synk): if T ever spans multiple sublane tiles / is not a power of two,
    # re-verify pltpu.roll(axis=0) delivery across the (8,128) tile boundary.

    # Approximate reciprocal on the EUP + one Newton step (f32-level accuracy, no divide).
    inv = pl.reciprocal(den, approx=True)
    inv = inv * (2.0 - den * inv)
    o_ref[...] = (num * inv).astype(o_ref.dtype)


def _pick_batch_tile(B, D):
    """Pick bt (batches folded per grid step) so bt*D is a multiple of 128 (lane-dense)."""
    if D % 128 == 0:
        # Plain (T, D) layout is already lane-dense; the block-diag weights grow as
        # (bt*D)^2, so keep bt = 1 and the plain scoring matmuls.
        return 1
    base = (D * 128) // math.gcd(D, 128) // D      # smallest bt with (bt*D) % 128 == 0
    bt = base
    # Grow toward a single grid step (amortizes the ~600-cycle per-step prologue on
    # single-TC v5e/v6e and avoids per-TC duplicated weight DMAs on v7x) while keeping
    # the (bt*D, bt*D) block-diag weight operands modest.
    while bt < B and (bt + base) * D <= 512:
        bt += base
    return bt


def _prepare_folded_weights(w1t, b1, w2, bt):
    """Constant prep, hoisted out of the per-call path (run once per weight set)."""
    D = w1t.shape[0]
    eye = jnp.eye(bt, dtype=w1t.dtype)
    w1_blk = jnp.kron(eye, w1t)                     # (btd, btd) block-diag W1^T
    b1_t = jnp.tile(b1, (1, bt))                    # (1, btd)
    g2 = jnp.kron(eye, jnp.tile(w2, (1, D)))        # (btd, btd): g2[bD+d, bD+e] = w2[d]
    return w1_blk, b1_t, g2


@functools.partial(jax.jit, static_argnames=("bt",))
def _attention_fold_call(x, w1_blk, b1_t, g2, *, bt):
    """x: (B, T, D). Folds batch into lanes, runs the Pallas kernel, unfolds."""
    B, T, D = x.shape
    bpad = -(-B // bt) * bt
    if bpad != B:                                   # skip the pad copy when B % bt == 0
        x = jnp.concatenate([x, jnp.zeros((bpad - B, T, D), x.dtype)], axis=0)
    n_tiles = bpad // bt
    btd = bt * D

    # Lane-dense folded layout: xf[t, b*D + d] = x[b, t, d].
    xf = jnp.transpose(x, (1, 0, 2)).reshape(T, bpad * D)

    out_f = pl.pallas_call(
        _attention_kernel,
        out_shape=jax.ShapeDtypeStruct((T, bpad * D), x.dtype),
        grid_spec=pltpu.PrefetchScalarGridSpec(
            num_scalar_prefetch=0,
            grid=(n_tiles,),
            in_specs=[
                pl.BlockSpec((T, btd), lambda i: (0, i)),    # x (folded, batch-tiled)
                pl.BlockSpec((btd, btd), lambda i: (0, 0)),  # blkdiag(W1^T)   (constant)
                pl.BlockSpec((1, btd), lambda i: (0, 0)),    # tiled b1        (constant)
                pl.BlockSpec((btd, btd), lambda i: (0, 0)),  # blkdiag(w2.1^T) (constant)
            ],
            out_specs=pl.BlockSpec((T, btd), lambda i: (0, i)),
        ),
        compiler_params=pltpu.CompilerParams(
            # Independent batch tiles; with the widened bt this is a single step at the
            # test shape (no serial per-step overhead on single-TC v5e/v6e).
            dimension_semantics=("parallel",),
        ),
    )(xf, w1_blk, b1_t, g2)

    return jnp.transpose(out_f.reshape(T, bpad, D)[:, :B, :], (1, 0, 2))


def make_attention_forward(w1t, b1, w2, *, batch_size):
    """Build a forward fn with all constant-weight prep hoisted out of the call path.

    w1t = W1.T (D, D); b1: (1, D); w2 = W2.T (D, 1). b2 is intentionally dropped: the
    softmax over prefix scores is shift-invariant and raw scores are never returned.
    """
    D = w1t.shape[0]
    bt = _pick_batch_tile(batch_size, D)
    w1_blk, b1_t, g2 = _prepare_folded_weights(w1t, b1, w2, bt)

    def forward(x):
        context = _attention_fold_call(x, w1_blk, b1_t, g2, bt=bt)
        # PyTorch module returns (context_vectors, attention_vectors=[]).
        return context, []

    return forward


def attention_pallas(x, w1t, b1, w2, b2=None):
    """One-shot convenience wrapper (prep not cached; prefer make_attention_forward)."""
    del b2  # no effect on the returned context (softmax shift-invariance)
    return make_attention_forward(w1t, b1, w2, batch_size=x.shape[0])(x)


def attention_ref(x, w1t, b1, w2, b2):
    """Pure-JAX replica of the PyTorch forward (verification only)."""
    scores = jnp.tanh(x @ w1t + b1) @ w2 + b2                            # (B, T, 1)
    B, T, D = x.shape
    outs = []
    for t in range(T):
        w = jax.nn.softmax(scores[:, : t + 1, :], axis=1)
        outs.append(jnp.sum(w * x[:, : t + 1, :], axis=1))
    return jnp.stack(outs, axis=1)                                       # (B, T, D)


def xavier_uniform(key, shape):
    fan_out, fan_in = shape
    bound = (6.0 / (fan_in + fan_out)) ** 0.5
    return jax.random.uniform(key, shape, jnp.float32, -bound, bound)


if __name__ == "__main__":
    B, T, D = 8, 8, 32  # batch, sequence, feature_dim

    key = jax.random.PRNGKey(0)
    kx, kw1, kw2 = jax.random.split(key, 3)
    x = jax.random.normal(kx, (B, T, D), jnp.float32)

    # nn.Linear stores (out_features, in_features); forward computes x @ W^T + b.
    W1 = xavier_uniform(kw1, (D, D))
    W2 = xavier_uniform(kw2, (1, D))
    b1 = jnp.zeros((1, D), jnp.float32)
    b2 = jnp.zeros((1, 1), jnp.float32)
    w1t = W1.T   # (D, D)
    w2 = W2.T    # (D, 1)

    # Constant prep hoisted out of the per-call path: build the forward fn once.
    forward = make_attention_forward(w1t, b1, w2, batch_size=B)
    context, attn_vecs = forward(x)
    context = jax.block_until_ready(context)

    ref = attention_ref(x, w1t, b1, w2, b2)
    assert context.shape == (B, T, D)
    assert attn_vecs == []
    max_err = float(jnp.max(jnp.abs(context - ref)))
    assert jnp.allclose(context, ref, atol=5e-4, rtol=5e-4), (
        f"mismatch vs reference (max |err| = {max_err})"
    )
    print("KERNEL_OK")
</pallas_src>

<mosaic_0001>
module attributes {stable_mosaic.version = 11 : i64} {
  func.func @_attention_kernel(%arg0: i32, %arg1: memref<8x256xf32, #tpu.memory_space<vmem>>, %arg2: memref<256x256xf32, #tpu.memory_space<vmem>>, %arg3: memref<1x256xf32, #tpu.memory_space<vmem>>, %arg4: memref<256x256xf32, #tpu.memory_space<vmem>>, %arg5: memref<8x256xf32, #tpu.memory_space<vmem>>) attributes {dimension_semantics = [#tpu.dimension_semantics<parallel>], iteration_bounds = array<i64: 1>, scalar_prefetch = 0 : i64, scratch_operands = 0 : i64, tpu.core_type = #tpu.core_type<tc>, window_params = [{transform_indices = @transform_0, window_bounds = array<i64: 8, 256>}, {pipeline_mode = #tpu.pipeline_mode<synchronous>, transform_indices = @transform_1, window_bounds = array<i64: 256, 256>}, {pipeline_mode = #tpu.pipeline_mode<synchronous>, transform_indices = @transform_2, window_bounds = array<i64: 1, 256>}, {pipeline_mode = #tpu.pipeline_mode<synchronous>, transform_indices = @transform_3, window_bounds = array<i64: 256, 256>}, {transform_indices = @transform_4, window_bounds = array<i64: 8, 256>}]} {
    %c0 = arith.constant 0 : index
    %c0_0 = arith.constant 0 : index
    %0 = vector.load %arg1[%c0, %c0_0] : memref<8x256xf32, #tpu.memory_space<vmem>>, vector<8x256xf32>
    %c0_1 = arith.constant 0 : index
    %c0_2 = arith.constant 0 : index
    %1 = vector.load %arg2[%c0_1, %c0_2] : memref<256x256xf32, #tpu.memory_space<vmem>>, vector<256x256xf32>
    %cst = arith.constant dense<0.000000e+00> : vector<8x256xf32>
    %2 = tpu.matmul %0, %1, %cst {dimension_numbers = #tpu.dot_dimension_numbers<[1], [0], [0], [1], [0, 0, 1, 1], [], []>} : vector<8x256xf32>, vector<256x256xf32>, vector<8x256xf32> -> vector<8x256xf32>
    %c0_3 = arith.constant 0 : index
    %c0_4 = arith.constant 0 : index
    %3 = vector.load %arg3[%c0_3, %c0_4] : memref<1x256xf32, #tpu.memory_space<vmem>>, vector<1x256xf32>
    %4 = vector.broadcast %3 : vector<1x256xf32> to vector<8x256xf32>
    %5 = arith.addf %2, %4 : vector<8x256xf32>
    %6 = math.tanh %5 : vector<8x256xf32>
    %c0_5 = arith.constant 0 : index
    %c0_6 = arith.constant 0 : index
    %7 = vector.load %arg4[%c0_5, %c0_6] : memref<256x256xf32, #tpu.memory_space<vmem>>, vector<256x256xf32>
    %cst_7 = arith.constant dense<0.000000e+00> : vector<8x256xf32>
    %8 = tpu.matmul %6, %7, %cst_7 {dimension_numbers = #tpu.dot_dimension_numbers<[1], [0], [0], [1], [0, 0, 1, 1], [], []>} : vector<8x256xf32>, vector<256x256xf32>, vector<8x256xf32> -> vector<8x256xf32>
    %cst_8 = arith.constant 1.000000e+00 : f32
    %9 = vector.broadcast %cst_8 : f32 to vector<8x256xf32>
    %10 = tpu.iota {dimensions = array<i32: 0>} : vector<8x256xi32>
    %c1_i32 = arith.constant 1 : i32
    %11 = vector.broadcast %c1_i32 : i32 to vector<8x256xi32>
    %12 = arith.cmpi sge, %10, %11 : vector<8x256xi32>
    %c1_i32_9 = arith.constant 1 : i32
    %13 = tpu.dynamic_rotate %8 by %c1_i32_9 dim 0 : vector<8x256xf32>, i32 -> vector<8x256xf32>
    %cst_10 = arith.constant -1.000000e+30 : f32
    %14 = vector.broadcast %cst_10 : f32 to vector<8x256xf32>
    %15 = arith.select %12, %13, %14 : vector<8x256xi1>, vector<8x256xf32>
    %c1_i32_11 = arith.constant 1 : i32
    %16 = tpu.dynamic_rotate %0 by %c1_i32_11 dim 0 : vector<8x256xf32>, i32 -> vector<8x256xf32>
    %cst_12 = arith.constant 0.000000e+00 : f32
    %17 = vector.broadcast %cst_12 : f32 to vector<8x256xf32>
    %18 = arith.select %12, %16, %17 : vector<8x256xi1>, vector<8x256xf32>
    %c1_i32_13 = arith.constant 1 : i32
    %19 = tpu.dynamic_rotate %9 by %c1_i32_13 dim 0 : vector<8x256xf32>, i32 -> vector<8x256xf32>
    %cst_14 = arith.constant 0.000000e+00 : f32
    %20 = vector.broadcast %cst_14 : f32 to vector<8x256xf32>
    %21 = arith.select %12, %19, %20 : vector<8x256xi1>, vector<8x256xf32>
    %22 = arith.subf %8, %15 : vector<8x256xf32>
    %23 = math.absf %22 : vector<8x256xf32>
    %cst_15 = arith.constant 0.000000e+00 : f32
    %24 = vector.broadcast %cst_15 : f32 to vector<8x256xf32>
    %25 = arith.subf %24, %23 : vector<8x256xf32>
    %26 = math.exp %25 : vector<8x256xf32>
    %cst_16 = arith.constant 0.000000e+00 : f32
    %27 = vector.broadcast %cst_16 : f32 to vector<8x256xf32>
    %28 = arith.cmpf oge, %22, %27 : vector<8x256xf32>
    %cst_17 = arith.constant 1.000000e+00 : f32
    %29 = vector.broadcast %cst_17 : f32 to vector<8x256xf32>
    %30 = arith.select %28, %29, %26 : vector<8x256xi1>, vector<8x256xf32>
    %cst_18 = arith.constant 1.000000e+00 : f32
    %31 = vector.broadcast %cst_18 : f32 to vector<8x256xf32>
    %32 = arith.select %28, %26, %31 : vector<8x256xi1>, vector<8x256xf32>
    %33 = arith.mulf %0, %30 : vector<8x256xf32>
    %34 = arith.mulf %18, %32 : vector<8x256xf32>
    %35 = arith.addf %33, %34 : vector<8x256xf32>
    %36 = arith.mulf %9, %30 : vector<8x256xf32>
    %37 = arith.mulf %21, %32 : vector<8x256xf32>
    %38 = arith.addf %36, %37 : vector<8x256xf32>
    %39 = arith.maximumf %8, %15 : vector<8x256xf32>
    %c2_i32 = arith.constant 2 : i32
    %40 = vector.broadcast %c2_i32 : i32 to vector<8x256xi32>
    %41 = arith.cmpi sge, %10, %40 : vector<8x256xi32>
    %c2_i32_19 = arith.constant 2 : i32
    %42 = tpu.dynamic_rotate %39 by %c2_i32_19 dim 0 : vector<8x256xf32>, i32 -> vector<8x256xf32>
    %cst_20 = arith.constant -1.000000e+30 : f32
    %43 = vector.broadcast %cst_20 : f32 to vector<8x256xf32>
    %44 = arith.select %41, %42, %43 : vector<8x256xi1>, vector<8x256xf32>
    %c2_i32_21 = arith.constant 2 : i32
    %45 = tpu.dynamic_rotate %35 by %c2_i32_21 dim 0 : vector<8x256xf32>, i32 -> vector<8x256xf32>
    %cst_22 = arith.constant 0.000000e+00 : f32
    %46 = vector.broadcast %cst_22 : f32 to vector<8x256xf32>
    %47 = arith.select %41, %45, %46 : vector<8x256xi1>, vector<8x256xf32>
    %c2_i32_23 = arith.constant 2 : i32
    %48 = tpu.dynamic_rotate %38 by %c2_i32_23 dim 0 : vector<8x256xf32>, i32 -> vector<8x256xf32>
    %cst_24 = arith.constant 0.000000e+00 : f32
    %49 = vector.broadcast %cst_24 : f32 to vector<8x256xf32>
    %50 = arith.select %41, %48, %49 : vector<8x256xi1>, vector<8x256xf32>
    %51 = arith.subf %39, %44 : vector<8x256xf32>
    %52 = math.absf %51 : vector<8x256xf32>
    %cst_25 = arith.constant 0.000000e+00 : f32
    %53 = vector.broadcast %cst_25 : f32 to vector<8x256xf32>
    %54 = arith.subf %53, %52 : vector<8x256xf32>
    %55 = math.exp %54 : vector<8x256xf32>
    %cst_26 = arith.constant 0.000000e+00 : f32
    %56 = vector.broadcast %cst_26 : f32 to vector<8x256xf32>
    %57 = arith.cmpf oge, %51, %56 : vector<8x256xf32>
    %cst_27 = arith.constant 1.000000e+00 : f32
    %58 = vector.broadcast %cst_27 : f32 to vector<8x256xf32>
    %59 = arith.select %57, %58, %55 : vector<8x256xi1>, vector<8x256xf32>
    %cst_28 = arith.constant 1.000000e+00 : f32
    %60 = vector.broadcast %cst_28 : f32 to vector<8x256xf32>
    %61 = arith.select %57, %55, %60 : vector<8x256xi1>, vector<8x256xf32>
    %62 = arith.mulf %35, %59 : vector<8x256xf32>
    %63 = arith.mulf %47, %61 : vector<8x256xf32>
    %64 = arith.addf %62, %63 : vector<8x256xf32>
    %65 = arith.mulf %38, %59 : vector<8x256xf32>
    %66 = arith.mulf %50, %61 : vector<8x256xf32>
    %67 = arith.addf %65, %66 : vector<8x256xf32>
    %68 = arith.maximumf %39, %44 : vector<8x256xf32>
    %c4_i32 = arith.constant 4 : i32
    %69 = vector.broadcast %c4_i32 : i32 to vector<8x256xi32>
    %70 = arith.cmpi sge, %10, %69 : vector<8x256xi32>
    %c4_i32_29 = arith.constant 4 : i32
    %71 = tpu.dynamic_rotate %68 by %c4_i32_29 dim 0 : vector<8x256xf32>, i32 -> vector<8x256xf32>
    %cst_30 = arith.constant -1.000000e+30 : f32
    %72 = vector.broadcast %cst_30 : f32 to vector<8x256xf32>
    %73 = arith.select %70, %71, %72 : vector<8x256xi1>, vector<8x256xf32>
    %c4_i32_31 = arith.constant 4 : i32
    %74 = tpu.dynamic_rotate %64 by %c4_i32_31 dim 0 : vector<8x256xf32>, i32 -> vector<8x256xf32>
    %cst_32 = arith.constant 0.000000e+00 : f32
    %75 = vector.broadcast %cst_32 : f32 to vector<8x256xf32>
    %76 = arith.select %70, %74, %75 : vector<8x256xi1>, vector<8x256xf32>
    %c4_i32_33 = arith.constant 4 : i32
    %77 = tpu.dynamic_rotate %67 by %c4_i32_33 dim 0 : vector<8x256xf32>, i32 -> vector<8x256xf32>
    %cst_34 = arith.constant 0.000000e+00 : f32
    %78 = vector.broadcast %cst_34 : f32 to vector<8x256xf32>
    %79 = arith.select %70, %77, %78 : vector<8x256xi1>, vector<8x256xf32>
    %80 = arith.subf %68, %73 : vector<8x256xf32>
    %81 = math.absf %80 : vector<8x256xf32>
    %cst_35 = arith.constant 0.000000e+00 : f32
    %82 = vector.broadcast %cst_35 : f32 to vector<8x256xf32>
    %83 = arith.subf %82, %81 : vector<8x256xf32>
    %84 = math.exp %83 : vector<8x256xf32>
    %cst_36 = arith.constant 0.000000e+00 : f32
    %85 = vector.broadcast %cst_36 : f32 to vector<8x256xf32>
    %86 = arith.cmpf oge, %80, %85 : vector<8x256xf32>
    %cst_37 = arith.constant 1.000000e+00 : f32
    %87 = vector.broadcast %cst_37 : f32 to vector<8x256xf32>
    %88 = arith.select %86, %87, %84 : vector<8x256xi1>, vector<8x256xf32>
    %cst_38 = arith.constant 1.000000e+00 : f32
    %89 = vector.broadcast %cst_38 : f32 to vector<8x256xf32>
    %90 = arith.select %86, %84, %89 : vector<8x256xi1>, vector<8x256xf32>
    %91 = arith.mulf %64, %88 : vector<8x256xf32>
    %92 = arith.mulf %76, %90 : vector<8x256xf32>
    %93 = arith.addf %91, %92 : vector<8x256xf32>
    %94 = arith.mulf %67, %88 : vector<8x256xf32>
    %95 = arith.mulf %79, %90 : vector<8x256xf32>
    %96 = arith.addf %94, %95 : vector<8x256xf32>
    %97 = tpu.reciprocal %96 {approx = true} : vector<8x256xf32> -> vector<8x256xf32>
    %98 = arith.mulf %96, %97 : vector<8x256xf32>
    %cst_39 = arith.constant 2.000000e+00 : f32
    %99 = vector.broadcast %cst_39 : f32 to vector<8x256xf32>
    %100 = arith.subf %99, %98 : vector<8x256xf32>
    %101 = arith.mulf %97, %100 : vector<8x256xf32>
    %102 = arith.mulf %93, %101 : vector<8x256xf32>
    %c0_40 = arith.constant 0 : index
    %c0_41 = arith.constant 0 : index
    %103 = vector.load %arg5[%c0_40, %c0_41] : memref<8x256xf32, #tpu.memory_space<vmem>>, vector<8x256xf32>
    tpu.vector_store %arg5[%c0_40, %c0_41], %102 {strides = array<i32>} : memref<8x256xf32, #tpu.memory_space<vmem>>, vector<8x256xf32>,
    return
  }
  func.func @transform_0(%arg0: i32) -> (i32, i32) {
    %c0_i32 = arith.constant 0 : i32
    %c0_i32_0 = arith.constant 0 : i32
    return %c0_i32, %arg0 : i32, i32
  }
  func.func @transform_1(%arg0: i32) -> (i32, i32) {
    %c0_i32 = arith.constant 0 : i32
    %c0_i32_0 = arith.constant 0 : i32
    %c0_i32_1 = arith.constant 0 : i32
    return %c0_i32, %c0_i32_0 : i32, i32
  }
  func.func @transform_2(%arg0: i32) -> (i32, i32) {
    %c0_i32 = arith.constant 0 : i32
    %c0_i32_0 = arith.constant 0 : i32
    %c0_i32_1 = arith.constant 0 : i32
    return %c0_i32, %c0_i32_0 : i32, i32
  }
  func.func @transform_3(%arg0: i32) -> (i32, i32) {
    %c0_i32 = arith.constant 0 : i32
    %c0_i32_0 = arith.constant 0 : i32
    %c0_i32_1 = arith.constant 0 : i32
    return %c0_i32, %c0_i32_0 : i32, i32
  }
  func.func @transform_4(%arg0: i32) -> (i32, i32) {
    %c0_i32 = arith.constant 0 : i32
    %c0_i32_0 = arith.constant 0 : i32
    return %c0_i32, %arg0 : i32, i32
  }
}

</mosaic_0001>

<bundles_post_ra>
// kernel: _attention_fold_call.1
= control target key start
LH: loop header
LB: loop body
LE: loop exit
PB: predicated region body
PF: predicated region fallthrough
CT: control target
= control target key end

     0   :  { %9 = vsyncpa [#allocation3], 0  ;;  %s810_s0 = inlined_call_operand.vmem [shape: f32[8,256], index: 0, kind: input, shape index: {}]   ;;  %s811_s1 = inlined_call_operand.hbm [shape: f32[256,256], index: 1, kind: input, shape index: {}]   ;;  %s812_s2 = inlined_call_operand.vmem [shape: f32[1,256], index: 2, kind: input, shape index: {}]   ;;  %s813_s3 = inlined_call_operand.hbm [shape: f32[256,256], index: 3, kind: input, shape index: {}]   ;;  %s814_s4 = inlined_call_operand.vmem [shape: f32[8,256], index: 4, kind: output, shape index: {}]  }
   0x1   :  { %10 = vsyncpa [#allocation5], 0  ;;  %s674_s15 = smov [#allocation2]   ;;  %s626_s19 = scalar_lea.hbm %s811_s1, 8192 }
   0x2   :  { %s18_s16 = sshll.u32 %s674_s15, 4  ;;  %p627_p0 = scmp.ne.s32.totalorder %s811_s1, %s626_s19  ;;  %s19_s16 = int_to_ptr.vmem [resolvable:$true] %s18_s16 }
   0x3   :  { %p630_p1 = scmp.lt.u32.totalorder %s626_s19, %s811_s1 }
   0x5   :  { %p632_p2 = pnand %p630_p1, %p627_p0 }
   0x7   :  { %635 = shalt.err (!%p632_p2)
}
   0x8   :  { %s636_s24 = scalar_lea.vmem %s19_s16, 8192  ;;  %p641_p4 = scmp.lt.s32.totalorder %s19_s16, %s19_s16 }
   0x9   :  { %p637_p3 = scmp.ne.s32.totalorder %s19_s16, %s636_s24  ;;  %p642_p5 = scmp.lt.s32.totalorder %s636_s24, %s636_s24 }
   0xb   :  { %p643_p6 = por %p642_p5, %p641_p4 }
   0xd   :  { %p644_p7 = pnand %p643_p6, %p637_p3 }
   0xf   :  { %647 = shalt.err (!%p644_p7)
}
  0x10   :  { %s675_s25 = smov 256   ;;  %s676_s26 = smov 16  }
  0x11   :  { %24 = dma.hbm_to_vmem [thread:$0]  %s811_s1, 8192, %s19_s16, [#allocation3], %s675_s25, %s675_s25, %s676_s26  }
  0x12   :  { %s677_s29 = smov [#allocation4]   ;;  %s648_s7 = scalar_lea.hbm %s813_s3, 8192 }
  0x13   :  { %s32_s30 = sshll.u32 %s677_s29, 4  ;;  %p649_p8 = scmp.ne.s32.totalorder %s813_s3, %s648_s7  ;;  %s33_s30 = int_to_ptr.vmem [resolvable:$true] %s32_s30 }
  0x14   :  { %p652_p9 = scmp.lt.u32.totalorder %s648_s7, %s813_s3 }
  0x16   :  { %p654_p10 = pnand %p652_p9, %p649_p8 }
  0x18   :  { %657 = shalt.err (!%p654_p10)
}
  0x19   :  { %s658_s12 = scalar_lea.vmem %s33_s30, 8192  ;;  %p663_p12 = scmp.lt.s32.totalorder %s33_s30, %s33_s30 }
  0x1a   :  { %p659_p11 = scmp.ne.s32.totalorder %s33_s30, %s658_s12  ;;  %p664_p13 = scmp.lt.s32.totalorder %s658_s12, %s658_s12 }
  0x1c   :  { %p665_p0 = por %p664_p13, %p663_p12 }
  0x1e   :  { %p666_p1 = pnand %p665_p0, %p659_p11 }
  0x20   :  { %669 = shalt.err (!%p666_p1)
}
  0x21   :  { %38 = dma.hbm_to_vmem [thread:$0]  %s813_s3, 8192, %s33_s30, [#allocation5], %s675_s25, %s675_s25, %s676_s26  }
  0x22   :  { %670 = dma.done.wait [#allocation3], 8192  }
  0x23   :  { %671 = vsyncadd [#allocation3], 4294959104 }
  0x24   :  { %672 = dma.done.wait [#allocation5], 8192  }
  0x25   :  { %673 = vsyncadd [#allocation5], 4294959104  ;;  %v48_v0 = vld [vmem:[#allocation2 + $0x8] sm:$0xff]  ;;  %v50_v1 = vld [vmem:[#allocation2 + $0x18] sm:$0xff] }
  0x26   :  { %v47_v2 = vld [vmem:[#allocation2] sm:$0xff]  ;;  %v473_v3 = vpack.c.bf16 %v50_v1, %v48_v0  ;;  %v49_v4 = vld [vmem:[#allocation2 + $0x10] sm:$0xff]  ;;  %v52_v5 = vld [vmem:[#allocation2 + $0x28] sm:$0xff] }
  0x27   :  { %v54_v6 = vld [vmem:[#allocation2 + $0x38] sm:$0xff]  ;;  %v475_v7 = vpack.c.bf16 %v49_v4, %v47_v2  ;;  %v51_v9 = vld [vmem:[#allocation2 + $0x20] sm:$0xff]  ;;  %v53_v10 = vld [vmem:[#allocation2 + $0x30] sm:$0xff] }
  0x28   :  { %v477_v8 = vpack.c.bf16 %v54_v6, %v52_v5  ;;  %v56_v11 = vld [vmem:[#allocation2 + $0x48] sm:$0xff]  ;;  %474 = vmatprep.subr.bf16.mxu0 %v473_v3  ;;  %v58_v12 = vld [vmem:[#allocation2 + $0x58] sm:$0xff]  ;;  %v479_v13 = vpack.c.bf16 %v53_v10, %v51_v9  ;;  %v55_v15 = vld [vmem:[#allocation2 + $0x40] sm:$0xff] }
  0x29   :  { %476 = vmatpush1.bf16.msra.mxu0 %v475_v7  ;;  %v481_v14 = vpack.c.bf16 %v58_v12, %v56_v11  ;;  %v57_v16 = vld [vmem:[#allocation2 + $0x50] sm:$0xff]  ;;  %v60_v17 = vld [vmem:[#allocation2 + $0x68] sm:$0xff]  ;;  %v62_v18 = vld [vmem:[#allocation2 + $0x78] sm:$0xff] }
  0x2a   :  { %478 = vmatprep.subr.bf16.mxu0 %v477_v8  ;;  %v483_v19 = vpack.c.bf16 %v57_v16, %v55_v15  ;;  %v485_v20 = vpack.c.bf16 %v62_v18, %v60_v17  ;;  %v59_v21 = vld [vmem:[#allocation2 + $0x60] sm:$0xff]  ;;  %v61_v22 = vld [vmem:[#allocation2 + $0x70] sm:$0xff]  ;;  %v64_v23 = vld [vmem:[#allocation2 + $0x88] sm:$0xff] }
  0x2b   :  { %v66_v24 = vld [vmem:[#allocation2 + $0x98] sm:$0xff]  ;;  %v487_v25 = vpack.c.bf16 %v61_v22, %v59_v21  ;;  %v63_v27 = vld [vmem:[#allocation2 + $0x80] sm:$0xff]  ;;  %v65_v28 = vld [vmem:[#allocation2 + $0x90] sm:$0xff] }
  0x2c   :  { %v489_v26 = vpack.c.bf16 %v66_v24, %v64_v23  ;;  %v68_v29 = vld [vmem:[#allocation2 + $0xa8] sm:$0xff]  ;;  %v70_v30 = vld [vmem:[#allocation2 + $0xb8] sm:$0xff]  ;;  %v491_v31 = vpack.c.bf16 %v65_v28, %v63_v27  ;;  %v67_v33 = vld [vmem:[#allocation2 + $0xa0] sm:$0xff] }
  0x2d   :  { %480 = vmatpush1.bf16.msra.mxu0 %v479_v13  ;;  %v493_v32 = vpack.c.bf16 %v70_v30, %v68_v29  ;;  %v69_v34 = vld [vmem:[#allocation2 + $0xb0] sm:$0xff]  ;;  %v72_v35 = vld [vmem:[#allocation2 + $0xc8] sm:$0xff]  ;;  %v74_v36 = vld [vmem:[#allocation2 + $0xd8] sm:$0xff] }
  0x2e   :  { %482 = vmatprep.subr.bf16.mxu0 %v481_v14  ;;  %v495_v37 = vpack.c.bf16 %v69_v34, %v67_v33  ;;  %v71_v38 = vld [vmem:[#allocation2 + $0xc0] sm:$0xff]  ;;  %v73_v39 = vld [vmem:[#allocation2 + $0xd0] sm:$0xff]  ;;  %v497_v40 = vpack.c.bf16 %v74_v36, %v72_v35  ;;  %v76_v41 = vld [vmem:[#allocation2 + $0xe8] sm:$0xff] }
  0x2f   :  { %v78_v42 = vld [vmem:[#allocation2 + $0xf8] sm:$0xff]  ;;  %v731_v43 = vld [vmem:[%s810_s0 + $0x8] sm:$0xff]  ;;  %v196_v46 = vld [vmem:[#allocation4] sm:$0xff]  ;;  %v499_v51 = vpack.c.bf16 %v73_v39, %v71_v38 }
  0x30   :  { %187 = vmatprep.mubr.f32.mxu0 %v731_v43  ;;  %v197_v44 = vld [vmem:[#allocation4 + $0x8] sm:$0xff]  ;;  %v199_v45 = vld [vmem:[#allocation4 + $0x18] sm:$0xff]  ;;  %v198_v48 = vld [vmem:[#allocation4 + $0x10] sm:$0xff]  ;;  %v501_v57 = vpack.c.bf16 %v78_v42, %v76_v41 }
  0x31   :  { %484 = vmatpush1.bf16.msra.mxu0 %v483_v19  ;;  %v537_v47 = vpack.c.bf16 %v199_v45, %v197_v44  ;;  %v201_v49 = vld [vmem:[#allocation4 + $0x28] sm:$0xff]  ;;  %v203_v50 = vld [vmem:[#allocation4 + $0x38] sm:$0xff]  ;;  %v539_v52 = vpack.c.bf16 %v198_v48, %v196_v46  ;;  %v200_v54 = vld [vmem:[#allocation4 + $0x20] sm:$0xff] }
  0x32   :  { %486 = vmatprep.subr.bf16.mxu0 %v485_v20  ;;  %v541_v53 = vpack.c.bf16 %v203_v50, %v201_v49  ;;  %v202_v55 = vld [vmem:[#allocation4 + $0x30] sm:$0xff]  ;;  %v205_v56 = vld [vmem:[#allocation4 + $0x48] sm:$0xff]  ;;  %v75_v58 = vld [vmem:[#allocation2 + $0xe0] sm:$0xff] }
  0x33   :  { %v77_v59 = vld [vmem:[#allocation2 + $0xf0] sm:$0xff]  ;;  %538 = vmatprep.subr.bf16.mxu1 %v537_v47  ;;  %v207_v60 = vld [vmem:[#allocation4 + $0x58] sm:$0xff]  ;;  %v80_v61 = vld [vmem:[#allocation2 + $0x108] sm:$0xff]  ;;  %v543_v63 = vpack.c.bf16 %v202_v55, %v200_v54 }
  0x34   :  { %v82_v62 = vld [vmem:[#allocation2 + $0x118] sm:$0xff]  ;;  %540 = vmatpush1.bf16.msra.mxu1 %v539_v52  ;;  %v545_v0 = vpack.c.bf16 %v207_v60, %v205_v56  ;;  %v204_v1 = vld [vmem:[#allocation4 + $0x40] sm:$0xff]  ;;  %v206_v2 = vld [vmem:[#allocation4 + $0x50] sm:$0xff]  ;;  %v503_v3 = vpack.c.bf16 %v77_v59, %v75_v58 }
  0x35   :  { %488 = vmatpush1.bf16.msra.mxu0 %v487_v25  ;;  %542 = vmatprep.subr.bf16.mxu1 %v541_v53  ;;  %v209_v4 = vld [vmem:[#allocation4 + $0x68] sm:$0xff]  ;;  %v211_v5 = vld [vmem:[#allocation4 + $0x78] sm:$0xff]  ;;  %v505_v6 = vpack.c.bf16 %v82_v62, %v80_v61  ;;  %v79_v7 = vld [vmem:[#allocation2 + $0x100] sm:$0xff]  ;;  %v547_v11 = vpack.c.bf16 %v206_v2, %v204_v1 }
  0x36   :  { %490 = vmatprep.subr.bf16.mxu0 %v489_v26  ;;  %v81_v8 = vld [vmem:[#allocation2 + $0x110] sm:$0xff]  ;;  %v84_v9 = vld [vmem:[#allocation2 + $0x128] sm:$0xff]  ;;  %v86_v10 = vld [vmem:[#allocation2 + $0x138] sm:$0xff]  ;;  %v549_v12 = vpack.c.bf16 %v211_v5, %v209_v4 }
  0x37   :  { %v208_v13 = vld [vmem:[#allocation4 + $0x60] sm:$0xff]  ;;  %v210_v14 = vld [vmem:[#allocation4 + $0x70] sm:$0xff]  ;;  %v507_v15 = vpack.c.bf16 %v81_v8, %v79_v7  ;;  %v213_v16 = vld [vmem:[#allocation4 + $0x88] sm:$0xff]  ;;  %v509_v18 = vpack.c.bf16 %v86_v10, %v84_v9 }
  0x38   :  { %544 = vmatpush1.bf16.msra.mxu1 %v543_v63  ;;  %v215_v17 = vld [vmem:[#allocation4 + $0x98] sm:$0xff]  ;;  %v83_v19 = vld [vmem:[#allocation2 + $0x120] sm:$0xff]  ;;  %v85_v20 = vld [vmem:[#allocation2 + $0x130] sm:$0xff]  ;;  %v551_v23 = vpack.c.bf16 %v210_v14, %v208_v13 }
  0x39   :  { %492 = vmatpush1.bf16.msra.mxu0 %v491_v31  ;;  %546 = vmatprep.subr.bf16.mxu1 %v545_v0  ;;  %v88_v21 = vld [vmem:[#allocation2 + $0x148] sm:$0xff]  ;;  %v90_v22 = vld [vmem:[#allocation2 + $0x158] sm:$0xff]  ;;  %v553_v24 = vpack.c.bf16 %v215_v17, %v213_v16  ;;  %v212_v25 = vld [vmem:[#allocation4 + $0x80] sm:$0xff]  ;;  %v511_v27 = vpack.c.bf16 %v85_v20, %v83_v19 }
  0x3a   :  { %494 = vmatprep.subr.bf16.mxu0 %v493_v32  ;;  %v214_v26 = vld [vmem:[#allocation4 + $0x90] sm:$0xff]  ;;  %v217_v28 = vld [vmem:[#allocation4 + $0xa8] sm:$0xff]  ;;  %v219_v29 = vld [vmem:[#allocation4 + $0xb8] sm:$0xff]  ;;  %v513_v30 = vpack.c.bf16 %v90_v22, %v88_v21 }
  0x3b   :  { %v87_v31 = vld [vmem:[#allocation2 + $0x140] sm:$0xff]  ;;  %v89_v32 = vld [vmem:[#allocation2 + $0x150] sm:$0xff]  ;;  %v92_v33 = vld [vmem:[#allocation2 + $0x168] sm:$0xff]  ;;  %v555_v35 = vpack.c.bf16 %v214_v26, %v212_v25  ;;  %v557_v36 = vpack.c.bf16 %v219_v29, %v217_v28 }
  0x3c   :  { %548 = vmatpush1.bf16.msra.mxu1 %v547_v11  ;;  %v94_v34 = vld [vmem:[#allocation2 + $0x178] sm:$0xff]  ;;  %v218_v38 = vld [vmem:[#allocation4 + $0xb0] sm:$0xff]  ;;  %v515_v39 = vpack.c.bf16 %v89_v32, %v87_v31  ;;  %v91_v44 = vld [vmem:[#allocation2 + $0x160] sm:$0xff] }
  0x3d   :  { %496 = vmatpush1.bf16.msra.mxu0 %v495_v37  ;;  %550 = vmatprep.subr.bf16.mxu1 %v549_v12  ;;  %v216_v37 = vld [vmem:[#allocation4 + $0xa0] sm:$0xff]  ;;  %v223_v41 = vld [vmem:[#allocation4 + $0xd8] sm:$0xff]  ;;  %v517_v42 = vpack.c.bf16 %v94_v34, %v92_v33  ;;  %v93_v45 = vld [vmem:[#allocation2 + $0x170] sm:$0xff] }
  0x3e   :  { %498 = vmatprep.subr.bf16.mxu0 %v497_v40  ;;  %v221_v40 = vld [vmem:[#allocation4 + $0xc8] sm:$0xff]  ;;  %v98_v47 = vld [vmem:[#allocation2 + $0x198] sm:$0xff]  ;;  %v559_v48 = vpack.c.bf16 %v218_v38, %v216_v37  ;;  %v220_v50 = vld [vmem:[#allocation4 + $0xc0] sm:$0xff]  ;;  %v519_v52 = vpack.c.bf16 %v93_v45, %v91_v44 }
  0x3f   :  { %v96_v46 = vld [vmem:[#allocation2 + $0x188] sm:$0xff]  ;;  %v561_v49 = vpack.c.bf16 %v223_v41, %v221_v40  ;;  %v227_v54 = vld [vmem:[#allocation4 + $0xf8] sm:$0xff]  ;;  %v95_v56 = vld [vmem:[#allocation2 + $0x180] sm:$0xff] }
  0x40   :  { %552 = vmatpush1.bf16.msra.mxu1 %v551_v23  ;;  %v225_v53 = vld [vmem:[#allocation4 + $0xe8] sm:$0xff]  ;;  %v521_v55 = vpack.c.bf16 %v98_v47, %v96_v46  ;;  %v102_v59 = vld [vmem:[#allocation2 + $0x1b8] sm:$0xff]  ;;  %v224_v62 = vld [vmem:[#allocation4 + $0xe0] sm:$0xff] }
  0x41   :  { %500 = vmatpush1.bf16.msra.mxu0 %v499_v51  ;;  %554 = vmatprep.subr.bf16.mxu1 %v553_v24  ;;  %v222_v51 = vld [vmem:[#allocation4 + $0xd0] sm:$0xff]  ;;  %v100_v58 = vld [vmem:[#allocation2 + $0x1a8] sm:$0xff]  ;;  %v565_v61 = vpack.c.bf16 %v227_v54, %v225_v53  ;;  %v231_v2 = vld [vmem:[#allocation4 + $0x118] sm:$0xff] }
  0x42   :  { %502 = vmatprep.subr.bf16.mxu0 %v501_v57  ;;  %v97_v57 = vld [vmem:[#allocation2 + $0x190] sm:$0xff]  ;;  %v563_v60 = vpack.c.bf16 %v222_v51, %v220_v50  ;;  %v229_v1 = vld [vmem:[#allocation4 + $0x108] sm:$0xff]  ;;  %v99_v4 = vld [vmem:[#allocation2 + $0x1a0] sm:$0xff] }
  0x43   :  { %v226_v63 = vld [vmem:[#allocation4 + $0xf0] sm:$0xff]  ;;  %v523_v0 = vpack.c.bf16 %v97_v57, %v95_v56  ;;  %v106_v7 = vld [vmem:[#allocation2 + $0x1d8] sm:$0xff]  ;;  %v569_v9 = vpack.c.bf16 %v231_v2, %v229_v1  ;;  %v228_v10 = vld [vmem:[#allocation4 + $0x100] sm:$0xff] }
  0x44   :  { %556 = vmatpush1.bf16.msra.mxu1 %v555_v35  ;;  %v101_v5 = vld [vmem:[#allocation2 + $0x1b0] sm:$0xff]  ;;  %v567_v8 = vpack.c.bf16 %v226_v63, %v224_v62  ;;  %v233_v13 = vld [vmem:[#allocation4 + $0x128] sm:$0xff]  ;;  %v235_v14 = vld [vmem:[#allocation4 + $0x138] sm:$0xff] }
  0x45   :  { %504 = vmatpush1.bf16.msra.mxu0 %v503_v3  ;;  %558 = vmatprep.subr.bf16.mxu1 %v557_v36  ;;  %v525_v3 = vpack.c.bf16 %v102_v59, %v100_v58  ;;  %v230_v11 = vld [vmem:[#allocation4 + $0x110] sm:$0xff]  ;;  %v527_v12 = vpack.c.bf16 %v101_v5, %v99_v4  ;;  %v103_v16 = vld [vmem:[#allocation2 + $0x1c0] sm:$0xff]  ;;  %v110_v19 = vld [vmem:[#allocation2 + $0x1f8] sm:$0xff]  ;;  %v573_v21 = vpack.c.bf16 %v235_v14, %v233_v13  ;;  %v113_v4 = vlaneseq }
  0x46   :  { %506 = vmatprep.subr.bf16.mxu0 %v505_v6  ;;  %v104_v6 = vld [vmem:[#allocation2 + $0x1c8] sm:$0xff]  ;;  %v105_v17 = vld [vmem:[#allocation2 + $0x1d0] sm:$0xff]  ;;  %v571_v20 = vpack.c.bf16 %v230_v11, %v228_v10  ;;  %v232_v22 = vld [vmem:[#allocation4 + $0x120] sm:$0xff] }
  0x47   :  { %v234_v23 = vld [vmem:[#allocation4 + $0x130] sm:$0xff]  ;;  %v531_v24 = vpack.c.bf16 %v105_v17, %v103_v16  ;;  %v237_v25 = vld [vmem:[#allocation4 + $0x148] sm:$0xff]  ;;  %v239_v26 = vld [vmem:[#allocation4 + $0x158] sm:$0xff]  ;;  %v740_v5 = vshrl.u32 %v113_v4, 7 }
  0x48   :  { %560 = vmatpush1.bf16.msra.mxu1 %v559_v48  ;;  %v107_v28 = vld [vmem:[#allocation2 + $0x1e0] sm:$0xff]  ;;  %v109_v29 = vld [vmem:[#allocation2 + $0x1f0] sm:$0xff]  ;;  %v577_v31 = vpack.c.bf16 %v239_v26, %v237_v25  ;;  %v241_v35 = vld [vmem:[#allocation4 + $0x168] sm:$0xff] }
  0x49   :  { %508 = vmatpush1.bf16.msra.mxu0 %v507_v15  ;;  %562 = vmatprep.subr.bf16.mxu1 %v561_v49  ;;  %v529_v15 = vpack.c.bf16 %v106_v7, %v104_v6  ;;  %v236_v32 = vld [vmem:[#allocation4 + $0x140] sm:$0xff]  ;;  %v238_v33 = vld [vmem:[#allocation4 + $0x150] sm:$0xff]  ;;  %v535_v34 = vpack.c.bf16 %v109_v29, %v107_v28  ;;  %v243_v36 = vld [vmem:[#allocation4 + $0x178] sm:$0xff]  ;;  %v115_v6 = vsub.s32 0, %v740_v5  ;;  %vm333_vm0 = vcmp.ge.s32.totalorder %v740_v5, 1 }
  0x4a   :  { %510 = vmatprep.subr.bf16.mxu0 %v509_v18  ;;  %v108_v18 = vld [vmem:[#allocation2 + $0x1e8] sm:$0xff]  ;;  %v579_v37 = vpack.c.bf16 %v238_v33, %v236_v32  ;;  %v581_v38 = vpack.c.bf16 %v243_v36, %v241_v35  ;;  %v242_v40 = vld [vmem:[#allocation4 + $0x170] sm:$0xff]  ;;  %v737_v41 = vld [vmem:[%s810_s0] sm:$0xff]  ;;  %vm371_vm1 = vcmp.ge.s32.totalorder %v740_v5, 2  ;;  %vm414_vm2 = vcmp.ge.s32.totalorder %v740_v5, 4 }
  0x4b   :  { %v245_v44 = vld [vmem:[#allocation4 + $0x188] sm:$0xff]  ;;  %v247_v45 = vld [vmem:[#allocation4 + $0x198] sm:$0xff]  ;;  %v244_v47 = vld [vmem:[#allocation4 + $0x180] sm:$0xff] }
  0x4c   :  { %564 = vmatpush1.bf16.msra.mxu1 %v563_v60  ;;  %v585_v46 = vpack.c.bf16 %v247_v45, %v245_v44  ;;  %v246_v48 = vld [vmem:[#allocation4 + $0x190] sm:$0xff]  ;;  %v249_v50 = vld [vmem:[#allocation4 + $0x1a8] sm:$0xff]  ;;  %v251_v51 = vld [vmem:[#allocation4 + $0x1b8] sm:$0xff] }
  0x4d   :  { %512 = vmatpush1.bf16.msra.mxu0 %v511_v27  ;;  %566 = vmatprep.subr.bf16.mxu1 %v565_v61  ;;  %v533_v27 = vpack.c.bf16 %v110_v19, %v108_v18  ;;  %v587_v49 = vpack.c.bf16 %v246_v48, %v244_v47  ;;  %v248_v53 = vld [vmem:[#allocation4 + $0x1a0] sm:$0xff]  ;;  %v250_v54 = vld [vmem:[#allocation4 + $0x1b0] sm:$0xff]  ;;  %v253_v56 = vld [vmem:[#allocation4 + $0x1c8] sm:$0xff] }
  0x4e   :  { %514 = vmatprep.subr.bf16.mxu0 %v513_v30  ;;  %v575_v30 = vpack.c.bf16 %v234_v23, %v232_v22  ;;  %v255_v57 = vld [vmem:[#allocation4 + $0x1d8] sm:$0xff]  ;;  %v252_v58 = vld [vmem:[#allocation4 + $0x1c0] sm:$0xff]  ;;  %v254_v60 = vld [vmem:[#allocation4 + $0x1d0] sm:$0xff] }
  0x4f   :  { %v593_v59 = vpack.c.bf16 %v255_v57, %v253_v56  ;;  %v257_v61 = vld [vmem:[#allocation4 + $0x1e8] sm:$0xff]  ;;  %v259_v62 = vld [vmem:[#allocation4 + $0x1f8] sm:$0xff]  ;;  %v595_v63 = vpack.c.bf16 %v254_v60, %v252_v58  ;;  %v256_v1 = vld [vmem:[#allocation4 + $0x1e0] sm:$0xff]  ;;  %v338_v56 = vrot.slane %v737_v41, 7  ;;  %v339_v58 = vrot.slane %v731_v43, 7 }
  0x50   :  { %568 = vmatpush1.bf16.msra.mxu1 %v567_v8  ;;  %v258_v2 = vld [vmem:[#allocation4 + $0x1f0] sm:$0xff]  ;;  %v111_v7 = vld [vmem:[%s812_s2] sm:$0x3]  ;;  %v119_v8 = vsub.s32 1, %v740_v5 }
  0x51   :  { %516 = vmatpush1.bf16.msra.mxu0 %v515_v39  ;;  %570 = vmatprep.subr.bf16.mxu1 %v569_v9  ;;  %v240_v39 = vld [vmem:[#allocation4 + $0x160] sm:$0xff]  ;;  %v116_v9 = vrot.slane %v111_v7, %v115_v6 }
  0x52   :  { %518 = vmatprep.subr.bf16.mxu0 %v517_v42  ;;  %v583_v42 = vpack.c.bf16 %v242_v40, %v240_v39  ;;  %v120_v10 = vrot.slane %v111_v7, %v119_v8 }
  0x54   :  { %572 = vmatpush1.bf16.msra.mxu1 %v571_v20 }
  0x55   :  { %520 = vmatpush1.bf16.msra.mxu0 %v519_v52  ;;  %574 = vmatprep.subr.bf16.mxu1 %v573_v21  ;;  %v589_v52 = vpack.c.bf16 %v251_v51, %v249_v50 }
  0x56   :  { %522 = vmatprep.subr.bf16.mxu0 %v521_v55  ;;  %v591_v55 = vpack.c.bf16 %v250_v54, %v248_v53 }
  0x58   :  { %576 = vmatpush1.bf16.msra.mxu1 %v575_v30 }
  0x59   :  { %524 = vmatpush1.bf16.msra.mxu0 %v523_v0  ;;  %578 = vmatprep.subr.bf16.mxu1 %v577_v31  ;;  %v597_v0 = vpack.c.bf16 %v259_v62, %v257_v61  ;;  %v340_v62 = vsel %vm333_vm0, %v338_v56, 0.0 }
  0x5a   :  { %526 = vmatprep.subr.bf16.mxu0 %v525_v3  ;;  %v599_v3 = vpack.c.bf16 %v258_v2, %v256_v1  ;;  %v341_v1 = vsel %vm333_vm0, %v339_v58, 0.0  ;;  %v678_v2 = vmov 0.0  }
  0x5c   :  { %580 = vmatpush1.bf16.msra.mxu1 %v579_v37 }
  0x5d   :  { %528 = vmatpush1.bf16.msra.mxu0 %v527_v12  ;;  %582 = vmatprep.subr.bf16.mxu1 %v581_v38 }
  0x5e   :  { %530 = vmatprep.subr.bf16.mxu0 %v529_v15 }
  0x60   :  { %584 = vmatpush1.bf16.msra.mxu1 %v583_v42 }
  0x61   :  { %532 = vmatpush1.bf16.msra.mxu0 %v531_v24  ;;  %586 = vmatprep.subr.bf16.mxu1 %v585_v46 }
  0x62   :  { %534 = vmatprep.subr.bf16.mxu0 %v533_v27 }
  0x64   :  { %588 = vmatpush1.bf16.msra.mxu1 %v587_v49 }
  0x65   :  { %536 = vmatpush1.bf16.msra.mxu0 %v535_v34  ;;  %590 = vmatprep.subr.bf16.mxu1 %v589_v52 }
  0x68   :  { %188 = vmatmul.mubr.f32.vlgmr.msra.gmra.mrb[0].mxu0 %v737_v41  ;;  %592 = vmatpush1.bf16.msra.mxu1 %v591_v55 }
  0x69   :  { %594 = vmatprep.subr.bf16.mxu1 %v593_v59 }
  0x6c   :  { %596 = vmatpush1.bf16.msra.mxu1 %v595_v63 }
  0x6d   :  { %598 = vmatprep.subr.bf16.mxu1 %v597_v0 }
  0x70   :  { %600 = vmatpush1.bf16.msra.mxu1 %v599_v3  ;;  %v342_v3 = vsel %vm333_vm0, 1.0, %v678_v2 }
 0x13b   :  { %v189_v11 = vpop.f32.mrb[0].mxu0 }
 0x13c   :  { %v190_v12 = vadd.f32 %v189_v11, %v116_v9  ;;  %v191_v13 = vpop.f32.mrb[1].mxu0 }
 0x13d   :  { %v192_v14 = vadd.f32 %v191_v13, %v120_v10 }
 0x13f   :  { %606 = vtanh.f32 %v192_v14 }
 0x140   :  { %608 = vtanh.f32 %v190_v12 }
 0x149   :  { %v607_v15 = vpop.eup %606 }
 0x14a   :  { %v609_v16 = vpop.eup %608  ;;  %324 = vmatprep.mubr.f32.mxu1 %v607_v15 }
 0x14b   :  { %325 = vmatmul.mubr.f32.vlgmr.msra.gmra.mrb[0].mxu1 %v609_v16 }
 0x21e   :  { %v326_v17 = vpop.f32.mrb[0].mxu1 }
 0x21f   :  { %v334_v18 = vrot.slane %v326_v17, 7  ;;  %v328_v19 = vpop.f32.mrb[1].mxu1 }
 0x220   :  { %v335_v20 = vrot.slane %v328_v19, 7 }
 0x221   :  { %v336_v21 = vsel %vm333_vm0, %v334_v18, -1e+30 }
 0x222   :  { %v343_v22 = vsub.f32 %v326_v17, %v336_v21  ;;  %v369_v23 = vmax.f32 %v326_v17, %v336_v21  ;;  %v337_v24 = vsel %vm333_vm0, %v335_v20, -1e+30 }
 0x223   :  { %v344_v25 = vsub.f32 %v328_v19, %v337_v24  ;;  %v370_v26 = vmax.f32 %v328_v19, %v337_v24 }
 0x224   :  { %v345_v27 = vand.u32 2147483647, %v343_v22  ;;  %v372_v28 = vrot.slane %v369_v23, 6  ;;  %vm353_vm3 = vcmp.ge.f32.partialorder %v343_v22, 0.0 }
 0x225   :  { %v346_v29 = vand.u32 2147483647, %v344_v25  ;;  %v373_v30 = vrot.slane %v370_v26, 6  ;;  %vm354_vm4 = vcmp.ge.f32.partialorder %v344_v25, 0.0 }
 0x226   :  { %v347_v31 = vsub.f32 0.0, %v345_v27  ;;  %v374_v32 = vsel %vm371_vm1, %v372_v28, -1e+30 }
 0x227   :  { %v755_v33 = vsub.f32 %v369_v23, %v374_v32  ;;  %v412_v34 = vmax.f32 %v369_v23, %v374_v32  ;;  %v348_v35 = vsub.f32 0.0, %v346_v29  ;;  %v375_v36 = vsel %vm371_vm1, %v373_v30, -1e+30 }
 0x228   :  { %v349_v37 = vmul.f32 1.442695, %v347_v31  ;;  %v760_v38 = vsub.f32 %v370_v26, %v375_v36  ;;  %v413_v39 = vmax.f32 %v370_v26, %v375_v36 }
 0x229   :  { %v386_v40 = vand.u32 2147483647, %v755_v33  ;;  %v415_v42 = vrot.slane %v412_v34, 4  ;;  %v351_v44 = vmul.f32 1.442695, %v348_v35  ;;  %vm394_vm5 = vcmp.ge.f32.partialorder %v755_v33, 0.0 }
 0x22a   :  { %610 = vpow2.f32 %v349_v37  ;;  %v387_v45 = vand.u32 2147483647, %v760_v38  ;;  %v416_v46 = vrot.slane %v413_v39, 4  ;;  %vm395_vm6 = vcmp.ge.f32.partialorder %v760_v38, 0.0 }
 0x22b   :  { %v388_v47 = vsub.f32 0.0, %v386_v40  ;;  %v417_v48 = vsel %vm414_vm2, %v415_v42, -1e+30  ;;  %612 = vpow2.f32 %v351_v44 }
 0x22c   :  { %v766_v49 = vsub.f32 %v412_v34, %v417_v48  ;;  %v389_v50 = vsub.f32 0.0, %v387_v45  ;;  %v418_v51 = vsel %vm414_vm2, %v416_v46, -1e+30 }
 0x22d   :  { %v390_v52 = vmul.f32 1.442695, %v388_v47  ;;  %v770_v53 = vsub.f32 %v413_v39, %v418_v51 }
 0x22e   :  { %v429_v54 = vand.u32 2147483647, %v766_v49  ;;  %v392_v55 = vmul.f32 1.442695, %v389_v50  ;;  %vm437_vm7 = vcmp.ge.f32.partialorder %v766_v49, 0.0 }
 0x22f   :  { %614 = vpow2.f32 %v390_v52  ;;  %v430_v57 = vand.u32 2147483647, %v770_v53  ;;  %vm438_vm8 = vcmp.ge.f32.partialorder %v770_v53, 0.0 }
 0x230   :  { %v431_v59 = vsub.f32 0.0, %v429_v54  ;;  %616 = vpow2.f32 %v392_v55 }
 0x231   :  { %v432_v60 = vsub.f32 0.0, %v430_v57 }
 0x232   :  { %v433_v61 = vmul.f32 1.442695, %v431_v59 }
 0x233   :  { %v435_v63 = vmul.f32 1.442695, %v432_v60 }
 0x234   :  { %v611_v0 = vpop.eup %610  ;;  %618 = vpow2.f32 %v433_v61 }
 0x235   :  { %v613_v4 = vpop.eup %612  ;;  %v355_v6 = vsel %vm353_vm3, 1.0, %v611_v0  ;;  %v357_v7 = vsel %vm353_vm3, %v611_v0, 1.0  ;;  %620 = vpow2.f32 %v435_v63 }
 0x236   :  { %v359_v8 = vmul.f32 %v355_v6, %v737_v41  ;;  %v361_v9 = vmul.f32 %v357_v7, %v340_v62  ;;  %v356_v10 = vsel %vm354_vm4, 1.0, %v613_v4  ;;  %v358_v11 = vsel %vm354_vm4, %v613_v4, 1.0 }
 0x237   :  { %v360_v12 = vmul.f32 %v356_v10, %v731_v43  ;;  %v362_v13 = vmul.f32 %v358_v11, %v341_v1  ;;  %v365_v14 = vmul.f32 %v357_v7, %v342_v3  ;;  %v366_v15 = vmul.f32 %v358_v11, %v342_v3 }
 0x238   :  { %v363_v17 = vadd.f32 %v361_v9, %v359_v8 }
 0x239   :  { %v615_v16 = vpop.eup %614  ;;  %v367_v18 = vadd.f32 %v365_v14, %v355_v6  ;;  %v368_v19 = vadd.f32 %v366_v15, %v356_v10  ;;  %v364_v22 = vadd.f32 %v362_v13, %v360_v12 }
 0x23a   :  { %v617_v20 = vpop.eup %616  ;;  %v396_v21 = vsel %vm394_vm5, 1.0, %v615_v16  ;;  %v376_v25 = vrot.slane %v363_v17, 6  ;;  %v398_v26 = vsel %vm394_vm5, %v615_v16, 1.0 }
 0x23b   :  { %v380_v41 = vrot.slane %v367_v18, 6  ;;  %v381_v23 = vrot.slane %v368_v19, 6  ;;  %v397_v24 = vsel %vm395_vm6, 1.0, %v617_v20  ;;  %v399_v29 = vsel %vm395_vm6, %v617_v20, 1.0 }
 0x23c   :  { %v406_v30 = vmul.f32 %v396_v21, %v367_v18  ;;  %v377_v33 = vrot.slane %v364_v22, 6  ;;  %v407_v34 = vmul.f32 %v397_v24, %v368_v19  ;;  %v378_v37 = vsel %vm371_vm1, %v376_v25, 0.0 }
 0x23d   :  { %v382_v43 = vsel %vm371_vm1, %v380_v41, 0.0  ;;  %v383_v27 = vsel %vm371_vm1, %v381_v23, 0.0  ;;  %v402_v46 = vmul.f32 %v398_v26, %v378_v37  ;;  %v400_v53 = vmul.f32 %v396_v21, %v363_v17 }
 0x23e   :  { %v619_v28 = vpop.eup %618  ;;  %v408_v31 = vmul.f32 %v398_v26, %v382_v43  ;;  %v409_v35 = vmul.f32 %v399_v29, %v383_v27  ;;  %v379_v42 = vsel %vm371_vm1, %v377_v33, 0.0  ;;  %v401_v58 = vmul.f32 %v397_v24, %v364_v22 }
 0x23f   :  { %v621_v32 = vpop.eup %620  ;;  %v439_v39 = vsel %vm437_vm7, 1.0, %v619_v28  ;;  %v441_v47 = vsel %vm437_vm7, %v619_v28, 1.0  ;;  %v403_v54 = vmul.f32 %v399_v29, %v379_v42  ;;  %v404_v60 = vadd.f32 %v402_v46, %v400_v53 }
 0x240   :  { %v410_v36 = vadd.f32 %v408_v31, %v406_v30  ;;  %v411_v38 = vadd.f32 %v409_v35, %v407_v34  ;;  %v440_v45 = vsel %vm438_vm8, 1.0, %v621_v32  ;;  %v442_v51 = vsel %vm438_vm8, %v621_v32, 1.0 }
 0x241   :  { %v405_v61 = vadd.f32 %v403_v54, %v401_v58  ;;  %v419_v62 = vrot.slane %v404_v60, 4  ;;  %v443_v9 = vmul.f32 %v439_v39, %v404_v60 }
 0x242   :  { %v423_v40 = vrot.slane %v410_v36, 4  ;;  %v424_v44 = vrot.slane %v411_v38, 4  ;;  %v449_v49 = vmul.f32 %v439_v39, %v410_v36  ;;  %v450_v55 = vmul.f32 %v440_v45, %v411_v38 }
 0x243   :  { %v420_v63 = vrot.slane %v405_v61, 4  ;;  %v421_v0 = vsel %vm414_vm2, %v419_v62, 0.0  ;;  %v444_v11 = vmul.f32 %v440_v45, %v405_v61 }
 0x244   :  { %v425_v48 = vsel %vm414_vm2, %v423_v40, 0.0  ;;  %v426_v50 = vsel %vm414_vm2, %v424_v44, 0.0  ;;  %v445_v4 = vmul.f32 %v441_v47, %v421_v0 }
 0x245   :  { %v451_v52 = vmul.f32 %v441_v47, %v425_v48  ;;  %v452_v56 = vmul.f32 %v442_v51, %v426_v50  ;;  %v422_v1 = vsel %vm414_vm2, %v420_v63, 0.0 }
 0x246   :  { %v446_v7 = vmul.f32 %v442_v51, %v422_v1  ;;  %v447_v13 = vadd.f32 %v445_v4, %v443_v9 }
 0x247   :  { %v453_v57 = vadd.f32 %v451_v52, %v449_v49  ;;  %v454_v59 = vadd.f32 %v452_v56, %v450_v55 }
 0x248   :  { %v448_v15 = vadd.f32 %v446_v7, %v444_v11 }
 0x249   :  { %622 = vrcp.f32 %v453_v57 }
 0x24a   :  { %624 = vrcp.f32 %v454_v59 }
 0x253   :  { %v623_v2 = vpop.eup %622 }
 0x254   :  { %v625_v3 = vpop.eup %624  ;;  %v457_v6 = vmul.f32 %v623_v2, %v453_v57 }
 0x255   :  { %v458_v8 = vmul.f32 %v625_v3, %v454_v59 }
 0x256   :  { %v459_v10 = vsub.f32 2.0, %v457_v6 }
 0x257   :  { %v460_v12 = vsub.f32 2.0, %v458_v8 }
 0x258   :  { %v461_v14 = vmul.f32 %v623_v2, %v459_v10 }
 0x259   :  { %v462_v16 = vmul.f32 %v625_v3, %v460_v12 }
 0x25a   :  { %v463_v17 = vmul.f32 %v461_v14, %v447_v13 }
 0x25b   :  { %v464_v18 = vmul.f32 %v462_v16, %v448_v15 }
 0x25c   :  { %465 = vst [vmem:[%s814_s4] sm:$0xff] %v463_v17 }
 0x25d   :  { %466 = vst [vmem:[%s814_s4 + $0x8] sm:$0xff] %v464_v18 }
 0x25e   :  { %471 = vsyncpa [#allocation3], 1 }
 0x25f   :  { %472 = vsyncpa [#allocation5], 1 }

</bundles_post_ra>
